<compile_context>
chip_gen: v7x
topology: tpu7x:2x2x1
jax: 0.10.0
libtpu: 0.0.40
codegen_flags: <defaults>
</compile_context>

<pallas_src>
import math

import jax
import jax.numpy as jnp
from jax import lax
from jax.experimental import pallas as pl
from jax.experimental.pallas import tpu as pltpu


def _pos_enc_kernel(coef_ref, o_ref):
    """coef_ref: (2, FE) f32  [row 0: fold*div, row 1: pos_off*div + phase]
    o_ref:    (R, FE)       one tile of `fold`-packed positional encodings.
    arg(r, c) = global_folded_row(r) * coef[0, c] + coef[1, c];  pe = sin(arg).
    """
    R, FE = o_ref.shape
    base = pl.program_id(0) * R
    row = lax.broadcasted_iota(jnp.int32, (R, FE), 0) + base
    gfr = row.astype(jnp.float32)
    arg = gfr * coef_ref[0:1, :] + coef_ref[1:2, :]
    o_ref[...] = jnp.sin(arg).astype(o_ref.dtype)


def _coef_rows(embed_dim, fold):
    """Precompute the per-column coefficients for the folded layout (tiny, O(E))."""
    c = jnp.arange(fold * embed_dim, dtype=jnp.int32)
    d = c % embed_dim                                 # embedding dim index
    pos_off = (c // embed_dim).astype(jnp.float32)    # which of the `fold` positions
    div = jnp.exp((2 * (d // 2)).astype(jnp.float32)
                  * (-math.log(10000.0) / float(embed_dim)))
    phase = (d % 2).astype(jnp.float32) * (math.pi / 2.0)   # cos(x) = sin(x + pi/2)
    a = float(fold) * div                             # multiplier for the folded row idx
    b = pos_off * div + phase                         # constant per-column offset
    return jnp.stack([a, b], axis=0)                  # (2, fold*embed_dim)


def positional_encoding(x, embed_dim, max_len=5000, dtype=jnp.float32):
    """Returns pe[:, :seq_len] of shape (1, seq_len, embed_dim).

    x: array of shape (batch, seq_len, ...) — only seq_len is used, matching
    the PyTorch forward which ignores x's values. embed_dim must be even
    (the PyTorch reference itself requires this).
    """
    seq_len = x.shape[1]
    assert seq_len <= max_len
    assert embed_dim % 2 == 0, "PositionalEncoding requires even embed_dim"

    # Lane-density fold: pack `fold` consecutive positions per stored row when
    # embed_dim < 128 so the stored last dim is a full 128 lanes.
    fold = 1
    if embed_dim < 128 and 128 % embed_dim == 0:
        f = 128 // embed_dim
        if seq_len % f == 0:
            fold = f
    s_f = seq_len // fold            # folded row count
    fe = fold * embed_dim            # folded (lane) width

    # Tile over folded rows; 512 rows keeps double-buffered output small on v7x.
    if s_f <= 512:
        tile_rows, n_tiles = s_f, 1          # single block == full dim (always legal)
    else:
        tile_rows, n_tiles = 512, pl.cdiv(s_f, 512)   # 512 % 8 == 0; edge block masked

    coef = _coef_rows(embed_dim, fold)

    out = pl.pallas_call(
        _pos_enc_kernel,
        out_shape=jax.ShapeDtypeStruct((s_f, fe), dtype),
        grid=(n_tiles,),
        in_specs=[pl.BlockSpec((2, fe), lambda i: (0, 0))],
        out_specs=pl.BlockSpec((tile_rows, fe), lambda i: (i, 0)),
        compiler_params=pltpu.CompilerParams(
            dimension_semantics=("parallel",)),
    )(coef)

    # Row-major (s_f, fold*E) -> (1, seq_len, E) is a metadata-only reshape.
    return out.reshape(1, seq_len, embed_dim)


def _reference(seq_len, embed_dim):
    pos = jnp.arange(seq_len, dtype=jnp.float32)[:, None]
    div = jnp.exp(jnp.arange(0, embed_dim, 2, dtype=jnp.float32)
                  * (-(math.log(10000.0) / embed_dim)))
    pe = jnp.zeros((seq_len, embed_dim), jnp.float32)
    pe = pe.at[:, 0::2].set(jnp.sin(pos * div))
    pe = pe.at[:, 1::2].set(jnp.cos(pos * div))
    return pe[None]


if __name__ == "__main__":
    key = jax.random.PRNGKey(0)

    # Primary small case (matches the module's intended use): batch=2, seq=8, E=32.
    batch, seq_len, embed_dim = 2, 8, 32
    x = jax.random.normal(key, (batch, seq_len, embed_dim), dtype=jnp.float32)
    out = jax.block_until_ready(positional_encoding(x, embed_dim=embed_dim))
    ref = _reference(seq_len, embed_dim)
    assert out.shape == (1, seq_len, embed_dim), out.shape
    assert jnp.allclose(out, ref, atol=1e-4), "mismatch vs reference (small)"

    # Secondary check: exercises fold=2 packing (E=64 -> lane width 128).
    x2 = jnp.zeros((1, 128, 64), dtype=jnp.float32)
    out2 = jax.block_until_ready(positional_encoding(x2, embed_dim=64))
    ref2 = _reference(128, 64)
    assert out2.shape == (1, 128, 64)
    assert jnp.allclose(out2, ref2, atol=1e-4), "mismatch vs reference (fold=2)"

    # Tertiary check: exercises the multi-tile path (s_f > 512, partial edge block)
    # and larger sin arguments (looser tolerance for f32 argument reduction).
    x3 = jnp.zeros((1, 1040, 128), dtype=jnp.float32)
    out3 = jax.block_until_ready(positional_encoding(x3, embed_dim=128))
    ref3 = _reference(1040, 128)
    assert out3.shape == (1, 1040, 128)
    assert jnp.allclose(out3, ref3, atol=2e-3), "mismatch vs reference (tiled)"

    print("KERNEL_OK")
</pallas_src>

<mosaic_0001>
module attributes {stable_mosaic.version = 11 : i64} {
  func.func @_pos_enc_kernel(%arg0: i32, %arg1: memref<2x128xf32, #tpu.memory_space<vmem>>, %arg2: memref<2x128xf32, #tpu.memory_space<vmem>>) attributes {dimension_semantics = [#tpu.dimension_semantics<parallel>], iteration_bounds = array<i64: 1>, scalar_prefetch = 0 : i64, scratch_operands = 0 : i64, tpu.core_type = #tpu.core_type<tc>, window_params = [{pipeline_mode = #tpu.pipeline_mode<synchronous>, transform_indices = @transform_0, window_bounds = array<i64: 2, 128>}, {transform_indices = @transform_1, window_bounds = array<i64: 2, 128>}]} {
    %c2_i32 = arith.constant 2 : i32
    %0 = arith.muli %arg0, %c2_i32 : i32
    %1 = tpu.iota {dimensions = array<i32: 0>} : vector<2x128xi32>
    %2 = vector.broadcast %0 : i32 to vector<2x128xi32>
    %3 = arith.addi %1, %2 : vector<2x128xi32>
    %4 = arith.sitofp %3 : vector<2x128xi32> to vector<2x128xf32>
    %c0 = arith.constant 0 : index
    %c0_0 = arith.constant 0 : index
    %5 = vector.load %arg1[%c0, %c0_0] : memref<2x128xf32, #tpu.memory_space<vmem>>, vector<1x128xf32>
    %6 = vector.broadcast %5 : vector<1x128xf32> to vector<2x128xf32>
    %7 = arith.mulf %4, %6 : vector<2x128xf32>
    %c1 = arith.constant 1 : index
    %c0_1 = arith.constant 0 : index
    %8 = vector.load %arg1[%c1, %c0_1] : memref<2x128xf32, #tpu.memory_space<vmem>>, vector<1x128xf32>
    %9 = vector.broadcast %8 : vector<1x128xf32> to vector<2x128xf32>
    %10 = arith.addf %7, %9 : vector<2x128xf32>
    %11 = math.sin %10 : vector<2x128xf32>
    %c0_2 = arith.constant 0 : index
    %c0_3 = arith.constant 0 : index
    %12 = vector.load %arg2[%c0_2, %c0_3] : memref<2x128xf32, #tpu.memory_space<vmem>>, vector<2x128xf32>
    tpu.vector_store %arg2[%c0_2, %c0_3], %11 {strides = array<i32>} : memref<2x128xf32, #tpu.memory_space<vmem>>, vector<2x128xf32>,
    return
  }
  func.func @transform_0(%arg0: i32) -> (i32, i32) {
    %c0_i32 = arith.constant 0 : i32
    %c0_i32_0 = arith.constant 0 : i32
    %c0_i32_1 = arith.constant 0 : i32
    return %c0_i32, %c0_i32_0 : i32, i32
  }
  func.func @transform_1(%arg0: i32) -> (i32, i32) {
    %c0_i32 = arith.constant 0 : i32
    %c0_i32_0 = arith.constant 0 : i32
    return %arg0, %c0_i32 : i32, i32
  }
}

</mosaic_0001>

<bundles_post_ra>
// kernel: tpu_custom_call.1
= control target key start
LH: loop header
LB: loop body
LE: loop exit
PB: predicated region body
PF: predicated region fallthrough
CT: control target
= control target key end

     0   :  { %6 = vsyncpa [#allocation3], 0  ;;  %s292_s0 = inlined_call_operand.hbm [shape: f32[2,128], index: 0, kind: input, shape index: {}]   ;;  %s293_s1 = inlined_call_operand.hbm [shape: f32[2,128], index: 1, kind: output, shape index: {}]  }
   0x1   :  { %7 = vsyncpa [#allocation4], 0  ;;  %s229_s6 = smov [#allocation2]   ;;  %s181_s10 = scalar_lea.hbm %s292_s0, 32 }
   0x2   :  { %s14_s7 = sshll.u32 %s229_s6, 4  ;;  %p182_p0 = scmp.ne.s32.totalorder %s292_s0, %s181_s10  ;;  %s15_s7 = int_to_ptr.vmem [resolvable:$true] %s14_s7 }
   0x3   :  { %p185_p1 = scmp.lt.u32.totalorder %s181_s10, %s292_s0 }
   0x5   :  { %p187_p2 = pnand %p185_p1, %p182_p0 }
   0x7   :  { %190 = shalt.err (!%p187_p2)
}
   0x8   :  { %s191_s15 = scalar_lea.vmem %s15_s7, 32  ;;  %p196_p4 = scmp.lt.s32.totalorder %s15_s7, %s15_s7 }
   0x9   :  { %p192_p3 = scmp.ne.s32.totalorder %s15_s7, %s191_s15  ;;  %p197_p5 = scmp.lt.s32.totalorder %s191_s15, %s191_s15 }
   0xb   :  { %p198_p6 = por %p197_p5, %p196_p4 }
   0xd   :  { %p199_p7 = pnand %p198_p6, %p192_p3 }
   0xf   :  { %202 = shalt.err (!%p199_p7)
}
  0x10   :  { %17 = dma.hbm_to_vmem [thread:$0]  %s292_s0, 32, %s15_s7, [#allocation3]  }
  0x11   :  { %225 = dma.done.wait [#allocation3], 32  }
  0x12   :  { %226 = vsyncadd [#allocation3], 4294967264  ;;  %v22_v0 = vlaneseq  ;;  %v159_v3 = vld [vmem:[#allocation2] ss:$0 sm:$0xff]  ;;  %v160_v4 = vld [vmem:[#allocation2 + $0x1] ss:$0 sm:$0xff] }
  0x13   :  { %v230_v18 = vmov 683565275   ;;  %v231_v20 = vmov 2475754826   ;;  %v232_v22 = vmov 2131351028  }
  0x14   :  { %v23_v1 = vshrl.u32 %v22_v0, 7  ;;  %v233_v24 = vmov 2102212464   ;;  %v234_v26 = vmov 920167782   ;;  %s236_s0 = smov [#allocation5]  }
  0x15   :  { %v235_v33 = vmov 1326507024   ;;  %s150_s18 = sshll.u32 %s236_s0, 4  ;;  %s151_s18 = int_to_ptr.vmem [resolvable:$true] %s150_s18 }
  0x16   :  { %v26_v2 = vcvt.s32.f32 %v23_v1  ;;  %s203_s19 = scalar_lea.vmem %s151_s18, 32  ;;  %p208_p9 = scmp.lt.s32.totalorder %s151_s18, %s151_s18 }
  0x17   :  { %p204_p8 = scmp.ne.s32.totalorder %s151_s18, %s203_s19  ;;  %p209_p10 = scmp.lt.s32.totalorder %s203_s19, %s203_s19 }
  0x18   :  { %v32_v5 = vmul.f32 %v159_v3, %v26_v2 }
  0x19   :  { %p210_p11 = por %p209_p10, %p208_p9 }
  0x1a   :  { %v259_v6 = vadd.f32 %v160_v4, %v32_v5 }
  0x1b   :  { %p211_p12 = pnand %p210_p11, %p204_p8 }
  0x1c   :  { %v42_v7 = vand.u32 2139095040, %v259_v6  ;;  %v39_v9 = vand.u32 2147483647, %v259_v6  ;;  %vm41_vm7 = vcmp.lt.s32.totalorder %v259_v6, 0  ;;  %vm131_vm12 = vweird.f32 %v259_v6 }
  0x1e   :  { %v43_v8 = vshrl.u32 %v42_v7, 23  ;;  %v46_v12 = vand.u32 8388607, %v39_v9  ;;  %vm40_vm8 = vcmp.le.f32.partialorder %v39_v9, 0.7853982 }
  0x20   :  { %v161_v10 = vadd.s32 4294967169, %v43_v8  ;;  %v47_v15 = vor.u32 8388608, %v46_v12 }
  0x22   :  { %v49_v11 = vadd.s32 1, %v161_v10  ;;  %v87_v35 = vshll.u32 %v47_v15, 8 }
  0x24   :  { %vm50_vm0 = vcmp.gt.s32.totalorder %v49_v11, 0 }
  0x25   :  { %v51_v13 = vsel %vm50_vm0, %v49_v11, 0 }
  0x26   :  { %v53_v14 = vand.u32 31, %v51_v13  ;;  %v52_v16 = vshrl.u32 %v51_v13, 5 }
  0x28   :  { %v54_v17 = vsub.s32 32, %v53_v14  ;;  %v56_v19 = vshll.u32 %v230_v18, %v53_v14  ;;  %v59_v21 = vshll.u32 %v231_v20, %v53_v14  ;;  %v62_v23 = vshll.u32 %v232_v22, %v53_v14 }
  0x29   :  { %v65_v25 = vshll.u32 %v233_v24, %v53_v14  ;;  %v68_v27 = vshll.u32 %v234_v26, %v53_v14  ;;  %vm71_vm1 = vcmp.lt.s32.totalorder %v52_v16, 1  ;;  %vm74_vm2 = vcmp.lt.s32.totalorder %v52_v16, 4 }
  0x2a   :  { %v55_v28 = vshrl.u32 %v230_v18, %v54_v17  ;;  %v57_v29 = vshrl.u32 %v231_v20, %v54_v17  ;;  %v60_v30 = vshrl.u32 %v232_v22, %v54_v17  ;;  %v63_v31 = vshrl.u32 %v233_v24, %v54_v17 }
  0x2b   :  { %v66_v32 = vshrl.u32 %v234_v26, %v54_v17  ;;  %v69_v34 = vshrl.u32 %v235_v33, %v54_v17  ;;  %vm72_vm3 = vcmp.lt.s32.totalorder %v52_v16, 2  ;;  %vm73_vm4 = vcmp.lt.s32.totalorder %v52_v16, 3 }
  0x2c   :  { %v58_v36 = vor.u32 %v57_v29, %v56_v19  ;;  %v61_v37 = vor.u32 %v60_v30, %v59_v21  ;;  %v64_v38 = vor.u32 %v63_v31, %v62_v23 }
  0x2d   :  { %v67_v39 = vor.u32 %v66_v32, %v65_v25  ;;  %v70_v40 = vor.u32 %v69_v34, %v68_v27 }
  0x2e   :  { %v75_v41 = vsel %vm71_vm1, %v55_v28, %v58_v36  ;;  %v76_v42 = vsel %vm74_vm2, %v64_v38, 2102212464  ;;  %v79_v43 = vsel %vm71_vm1, %v58_v36, %v61_v37  ;;  %v83_v44 = vsel %vm71_vm1, %v61_v37, %v64_v38 }
  0x2f   :  { %v77_v45 = vsel %vm73_vm4, %v61_v37, %v76_v42  ;;  %v80_v46 = vsel %vm74_vm2, %v67_v39, 920167782  ;;  %v84_v47 = vsel %vm74_vm2, %v70_v40, 1326507024 }
  0x30   :  { %v81_v48 = vsel %vm73_vm4, %v64_v38, %v80_v46  ;;  %v85_v49 = vsel %vm73_vm4, %v67_v39, %v84_v47  ;;  %v78_v50 = vsel %vm72_vm3, %v75_v41, %v77_v45 }
  0x31   :  { %v82_v51 = vsel %vm72_vm3, %v79_v43, %v81_v48  ;;  %v86_v52 = vsel %vm72_vm3, %v83_v44, %v85_v49  ;;  %v94_v57 = vmul.u32 %v87_v35, %v78_v50 }
  0x32   :  { %v265_v53 = vmul.u32.u64.low %v87_v35, %v86_v52  ;;  %v266_v54 = vmul.u32.u64.high %v87_v35, %v86_v52, %v265_v53  ;;  %v268_v55 = vmul.u32.u64.low %v87_v35, %v82_v51  ;;  %v269_v56 = vmul.u32.u64.high %v87_v35, %v82_v51, %v268_v55 }
  0x34   :  { %vm96_vm5 = vc.u32 %v266_v54, %v268_v55  ;;  %v97_v58 = vadd.s32 1, %v269_v56  ;;  %v95_v5 = vadd.s32 %v268_v55, %v266_v54 }
  0x36   :  { %v98_v59 = vsel %vm96_vm5, %v97_v58, %v269_v56 }
  0x37   :  { %v99_v60 = vadd.s32 %v98_v59, %v94_v57 }
  0x39   :  { %v100_v61 = vadd.s32 536870912, %v99_v60 }
  0x3b   :  { %v101_v62 = vshrl.u32 %v100_v61, 30 }
  0x3d   :  { %v102_v63 = vshll.u32 %v101_v62, 30  ;;  %v125_v19 = vsub.s32 4, %v101_v62 }
  0x3f   :  { %v103_v0 = vsub.s32 %v99_v60, %v102_v63  ;;  %v126_v22 = vsel %vm41_vm7, %v125_v19, %v101_v62 }
  0x40   :  { %v128_v25 = vsel %vm40_vm8, 0, %v126_v22 }
  0x41   :  { %v105_v1 = vsub.s32 0, %v103_v0  ;;  %v132_v26 = vadd.s32 3, %v128_v25 }
  0x43   :  { %v162_v2 = vmin.u32 %v105_v1, %v103_v0  ;;  %v133_v27 = vand.u32 3, %v132_v26 }
  0x45   :  { %v107_v3 = vclz %v162_v2  ;;  %vm138_vm9 = vcmp.eq.s32.totalorder %v133_v27, 2  ;;  %vm135_vm10 = vcmp.eq.s32.totalorder %v133_v27, 0  ;;  %vm134_vm11 = vcmp.lt.s32.totalorder %v133_v27, 2 }
  0x47   :  { %v163_v4 = vadd.s32 4294967294, %v107_v3 }
  0x49   :  { %vm164_vm6 = vcmp.lt.s32.totalorder %v163_v4, 0 }
  0x4a   :  { %v110_v7 = vsel %vm164_vm6, 0, %v163_v4 }
  0x4b   :  { %v111_v8 = vsub.s32 32, %v110_v7  ;;  %v112_v10 = vshll.u32 %v103_v0, %v110_v7  ;;  %v115_v11 = vsub.s32 4294967266, %v110_v7 }
  0x4d   :  { %v113_v12 = vshrl.u32 %v95_v5, %v111_v8  ;;  %v116_v13 = vadd.s32 127, %v115_v11 }
  0x4f   :  { %v114_v14 = vor.u32 %v113_v12, %v112_v10  ;;  %v117_v15 = vshll.u32 %v116_v13, 23 }
  0x51   :  { %v118_v16 = vor.u32 4788187, %v117_v15  ;;  %v121_v17 = vcvt.s32.f32 %v114_v14 }
  0x53   :  { %v119_v18 = vand.u32 2147483647, %v118_v16 }
  0x55   :  { %v122_v20 = vmul.f32 %v121_v17, %v119_v18 }
  0x57   :  { %v123_v21 = vxor.u32 2147483648, %v122_v20 }
  0x59   :  { %v124_v23 = vsel %vm41_vm7, %v123_v21, %v122_v20 }
  0x5a   :  { %v127_v24 = vsel %vm40_vm8, %v259_v6, %v124_v23 }
  0x5b   :  { %177 = vcosq.f32 %v127_v24 }
  0x5c   :  { %179 = vsinq.f32 %v127_v24 }
  0x65   :  { %v178_v28 = vpop.eup %177 }
  0x66   :  { %v180_v29 = vpop.eup %179  ;;  %v139_v30 = vxor.u32 2147483648, %v178_v28 }
  0x67   :  { %v136_v31 = vxor.u32 2147483648, %v180_v29 }
  0x68   :  { %v140_v9 = vsel %vm138_vm9, %v139_v30, %v180_v29 }
  0x69   :  { %v137_v32 = vsel %vm135_vm10, %v178_v28, %v136_v31 }
  0x6a   :  { %v141_v33 = vsel %vm134_vm11, %v137_v32, %v140_v9 }
  0x6b   :  { %v142_v34 = vsel %vm131_vm12, nan, %v141_v33 }
  0x6c   :  { %143 = vst [vmem:[#allocation5] sm:$0x3] %v142_v34 }
  0x6d   :  { %214 = shalt.err (!%p211_p12)
}
  0x6e   :  { %s215_s22 = scalar_lea.hbm %s293_s1, 32 }
  0x6f   :  { %p216_p13 = scmp.ne.s32.totalorder %s293_s1, %s215_s22  ;;  %p219_p0 = scmp.lt.u32.totalorder %s215_s22, %s293_s1 }
  0x71   :  { %p221_p1 = pnand %p219_p0, %p216_p13 }
  0x73   :  { %224 = shalt.err (!%p221_p1)
}
  0x74   :  { %153 = dma.vmem_to_hbm [thread:$0]  %s151_s18, 32, %s293_s1, [#allocation4]  }
  0x75   :  { %227 = dma.done.wait [#allocation4], 32  }
  0x76   :  { %228 = vsyncadd [#allocation4], 4294967264 }
  0x77   :  { %157 = vsyncpa [#allocation3], 1 }
  0x78   :  { %158 = vsyncpa [#allocation4], 1 }

</bundles_post_ra>
